<compile_context>
chip_gen: v7x
topology: tpu7x:2x2x1
jax: 0.10.0
libtpu: 0.0.40
codegen_flags: <defaults>
</compile_context>

<pallas_src>
import jax
import jax.numpy as jnp
from jax.experimental import pallas as pl
from jax.experimental.pallas import tpu as pltpu


def _round_up(n, m):
    return ((n + m - 1) // m) * m


def idp_fc_kernel(x_ref, w_ref, b_ref, o_ref):
    # x_ref: (TB, K)  w_ref: (K, CLS)  b_ref: (1, CLS)  o_ref: (TB, CLS)
    # Operands stay in their input dtype (f32 here; bf16 if the caller chose
    # it); accumulation is always f32 on the MXU.
    acc = jnp.dot(x_ref[...], w_ref[...], preferred_element_type=jnp.float32)
    o_ref[...] = (acc + b_ref[...].astype(jnp.float32)).astype(o_ref.dtype)


def fuse_idp_fc_params(w1, b1, w2, b2, *, seq_len, compute_dtype=jnp.float32):
    """One-time weight prep (hoisted out of the per-call path).

    Returns (w_mean, b_fused) with
      w_mean : (seq_len*C, classes) == tile(w1 @ w2, (seq_len, 1)) / seq_len
      b_fused: (1, classes)         == b1 @ w2 + b2
    so that  x.reshape(B, L*C) @ w_mean + b_fused
    equals   classifier(input_fc(x.mean(1))).
    """
    w1 = w1.astype(jnp.float32)
    w2 = w2.astype(jnp.float32)
    w_fused = jnp.dot(w1, w2)                                        # (C, CLS)
    b_fused = jnp.dot(b1.astype(jnp.float32), w2) + b2.astype(jnp.float32)
    w_mean = jnp.tile(w_fused, (seq_len, 1)) * (1.0 / jnp.float32(seq_len))
    # compute_dtype=bf16 is the recommended MXU fast path on v5e / v7x when
    # precision allows (accumulation stays f32 inside the kernel).
    return w_mean.astype(compute_dtype), b_fused.astype(jnp.float32)


# Conservative cross-generation budget for the pipelined VMEM buffers
# (v5e/v6e: 128 MiB physical / 16-32 MiB default scoped; v7x: 64 MiB physical).
_VMEM_BUDGET = 28 * 1024 * 1024
_TARGET_X_TILE_BYTES = 2 * 1024 * 1024   # amortize the ~0.35 us per-grid-step cost


def _choose_batch_tile(B, K, classes, x_itemsize, w_itemsize):
    """Pick batch tile TB (multiple of 8, or == B) from K and a VMEM budget."""
    lanes_x = _round_up(K, 128)          # lane padding of the x tile in VMEM
    lanes_o = _round_up(classes, 128)    # lane padding of the out tile in VMEM
    # Double-buffered x + out rows; resident fused weight (bias negligible).
    row_bytes = 2 * (lanes_x * x_itemsize + lanes_o * 4)
    w_bytes = 2 * _round_up(K, 8) * lanes_o * w_itemsize
    avail = max(_VMEM_BUDGET - w_bytes, 1 << 20)
    tb_vmem_cap = max(8, avail // row_bytes)
    # Big enough that each step moves ~_TARGET_X_TILE_BYTES of x from HBM.
    tb_overhead = max(8, _TARGET_X_TILE_BYTES // max(K * x_itemsize, 1))
    tb = int(min(tb_vmem_cap, tb_overhead, 4096))
    # Give both v7x TensorCores work once the batch is big enough.
    if B >= 16:
        tb = min(tb, pl.cdiv(B, 2))
    tb = max(8, (tb // 8) * 8)           # (8, 128) rule: multiple of 8 ...
    if tb >= B:
        tb = B                           # ... or equal to the full batch dim
    return tb


@jax.jit
def idp_fc_forward(x, w_mean, b_fused):
    """x: (B, L, C); w_mean: (L*C, classes); b_fused: (1, classes)."""
    B, L, C = x.shape
    K = L * C
    classes = w_mean.shape[1]
    assert w_mean.shape[0] == K, "w_mean must be fused for this sequence length"

    x2 = x.reshape(B, K)                 # contiguous reshape: no HBM copy
    tb = _choose_batch_tile(B, K, classes, x2.dtype.itemsize,
                            w_mean.dtype.itemsize)
    grid = (pl.cdiv(B, tb),)             # ragged last tile is masked by Pallas

    lanes_x = _round_up(K, 128)
    lanes_o = _round_up(classes, 128)
    vmem_needed = (2 * _round_up(tb, 8) * (lanes_x * x2.dtype.itemsize + lanes_o * 4)
                   + 2 * _round_up(K, 8) * lanes_o * w_mean.dtype.itemsize
                   + 2 * 8 * lanes_o * 4)
    vmem_limit = int(min(max(vmem_needed * 5 // 4, 16 << 20), 48 << 20))

    # NOTE: for very large K*classes the resident fused weight should instead be
    # streamed via a trailing "arbitrary" K-reduction grid axis + VMEM f32
    # accumulator; unnecessary at this module's sizes (classes=1, K=L*C small).
    return pl.pallas_call(
        idp_fc_kernel,
        out_shape=jax.ShapeDtypeStruct((B, classes), jnp.float32),
        grid=grid,
        in_specs=[
            pl.BlockSpec((tb, K), lambda i: (i, 0)),        # batch tile of x
            pl.BlockSpec((K, classes), lambda i: (0, 0)),   # fused weight (resident)
            pl.BlockSpec((1, classes), lambda i: (0, 0)),   # fused bias   (resident)
        ],
        out_specs=pl.BlockSpec((tb, classes), lambda i: (i, 0)),
        compiler_params=pltpu.CompilerParams(
            dimension_semantics=("parallel",),  # shard batch steps across TCs (v7x)
            vmem_limit_bytes=vmem_limit,
        ),
    )(x2, w_mean, b_fused)


def init_params(key, input_channels=5, hidden_dim=32, classes=1):
    """Deterministic init mimicking PyTorch nn.Linear (uniform +/- 1/sqrt(fan_in))."""
    k1, k2, k3, k4 = jax.random.split(key, 4)
    bound1 = 1.0 / jnp.sqrt(input_channels)
    bound2 = 1.0 / jnp.sqrt(hidden_dim)
    # stored transposed relative to PyTorch's (out, in) layout
    w1 = jax.random.uniform(k1, (input_channels, hidden_dim), jnp.float32,
                            -bound1, bound1)
    b1 = jax.random.uniform(k2, (1, hidden_dim), jnp.float32, -bound1, bound1)
    w2 = jax.random.uniform(k3, (hidden_dim, classes), jnp.float32,
                            -bound2, bound2)
    b2 = jax.random.uniform(k4, (1, classes), jnp.float32, -bound2, bound2)
    return w1, b1, w2, b2


if __name__ == "__main__":
    key = jax.random.PRNGKey(0)
    k_x, k_p = jax.random.split(key)

    B, L, C = 2, 8, 5          # batch, sequence, input_channels
    H, CLS = 32, 1             # hidden_dim, classes

    x = jax.random.normal(k_x, (B, L, C), jnp.float32)
    w1, b1, w2, b2 = init_params(k_p, input_channels=C, hidden_dim=H, classes=CLS)

    # Weight fusion done once, outside the per-call path.
    w_mean, b_fused = fuse_idp_fc_params(w1, b1, w2, b2, seq_len=L)

    out = idp_fc_forward(x, w_mean, b_fused)
    out = jax.block_until_ready(out)

    # pure-JAX reference (unfused, PyTorch semantics)
    ref = jnp.dot(jnp.dot(x.mean(axis=1), w1) + b1, w2) + b2
    assert out.shape == (B, CLS)
    assert jnp.allclose(out, ref, atol=1e-4, rtol=1e-4), (out, ref)

    print("KERNEL_OK")
</pallas_src>

<mosaic_0001>
module attributes {stable_mosaic.version = 11 : i64} {
  func.func @idp_fc_kernel(%arg0: i32, %arg1: memref<2x40xf32, #tpu.memory_space<vmem>>, %arg2: memref<40x1xf32, #tpu.memory_space<vmem>>, %arg3: memref<1x1xf32, #tpu.memory_space<vmem>>, %arg4: memref<2x1xf32, #tpu.memory_space<vmem>>) attributes {dimension_semantics = [#tpu.dimension_semantics<parallel>], iteration_bounds = array<i64: 1>, scalar_prefetch = 0 : i64, scratch_operands = 0 : i64, tpu.core_type = #tpu.core_type<tc>, window_params = [{transform_indices = @transform_0, window_bounds = array<i64: 2, 40>}, {pipeline_mode = #tpu.pipeline_mode<synchronous>, transform_indices = @transform_1, window_bounds = array<i64: 40, 1>}, {pipeline_mode = #tpu.pipeline_mode<synchronous>, transform_indices = @transform_2, window_bounds = array<i64: 1, 1>}, {transform_indices = @transform_3, window_bounds = array<i64: 2, 1>}]} {
    %c0 = arith.constant 0 : index
    %c0_0 = arith.constant 0 : index
    %0 = vector.load %arg1[%c0, %c0_0] : memref<2x40xf32, #tpu.memory_space<vmem>>, vector<2x40xf32>
    %c0_1 = arith.constant 0 : index
    %c0_2 = arith.constant 0 : index
    %1 = vector.load %arg2[%c0_1, %c0_2] : memref<40x1xf32, #tpu.memory_space<vmem>>, vector<40x1xf32>
    %cst = arith.constant dense<0.000000e+00> : vector<2x1xf32>
    %2 = tpu.matmul %0, %1, %cst {dimension_numbers = #tpu.dot_dimension_numbers<[1], [0], [0], [1], [0, 0, 1, 1], [], []>} : vector<2x40xf32>, vector<40x1xf32>, vector<2x1xf32> -> vector<2x1xf32>
    %c0_3 = arith.constant 0 : index
    %c0_4 = arith.constant 0 : index
    %3 = vector.load %arg3[%c0_3, %c0_4] : memref<1x1xf32, #tpu.memory_space<vmem>>, vector<1x1xf32>
    %4 = vector.broadcast %3 : vector<1x1xf32> to vector<2x1xf32>
    %5 = arith.addf %2, %4 : vector<2x1xf32>
    %c0_5 = arith.constant 0 : index
    %c0_6 = arith.constant 0 : index
    %6 = vector.load %arg4[%c0_5, %c0_6] : memref<2x1xf32, #tpu.memory_space<vmem>>, vector<2x1xf32>
    tpu.vector_store %arg4[%c0_5, %c0_6], %5 {strides = array<i32>} : memref<2x1xf32, #tpu.memory_space<vmem>>, vector<2x1xf32>,
    return
  }
  func.func @transform_0(%arg0: i32) -> (i32, i32) {
    %c0_i32 = arith.constant 0 : i32
    %c0_i32_0 = arith.constant 0 : i32
    return %arg0, %c0_i32 : i32, i32
  }
  func.func @transform_1(%arg0: i32) -> (i32, i32) {
    %c0_i32 = arith.constant 0 : i32
    %c0_i32_0 = arith.constant 0 : i32
    %c0_i32_1 = arith.constant 0 : i32
    return %c0_i32, %c0_i32_0 : i32, i32
  }
  func.func @transform_2(%arg0: i32) -> (i32, i32) {
    %c0_i32 = arith.constant 0 : i32
    %c0_i32_0 = arith.constant 0 : i32
    %c0_i32_1 = arith.constant 0 : i32
    return %c0_i32, %c0_i32_0 : i32, i32
  }
  func.func @transform_3(%arg0: i32) -> (i32, i32) {
    %c0_i32 = arith.constant 0 : i32
    %c0_i32_0 = arith.constant 0 : i32
    return %arg0, %c0_i32 : i32, i32
  }
}

</mosaic_0001>

<bundles_post_ra>
// kernel: idp_fc_forward.1
= control target key start
LH: loop header
LB: loop body
LE: loop exit
PB: predicated region body
PF: predicated region fallthrough
CT: control target
= control target key end

     0   :  { %v139_v0 = vmov 0.0|0.0   ;;  %vm140_vm0 = vmmov 0   ;;  %v141_v4 = vmov 0.0   ;;  %vm29_vm1 = vcmask 326656   ;;  %s186_s1 = inlined_call_operand.vmem [shape: f32[40,1], index: 1, kind: input, shape index: {}]   ;;  %s187_s2 = inlined_call_operand.<no memory space> [shape: f32[1,1], index: 2, kind: input, shape index: {}]   ;;  %s188_s0 = inlined_call_operand.vmem [shape: f32[2,40], index: 0, kind: input, shape index: {}]   ;;  %s189_s3 = inlined_call_operand.vmem [shape: f32[2,1], index: 3, kind: output, shape index: {}]  }
   0x1   :  { %130 = vmatprep.subr.bf16.mxu0 %v139_v0  ;;  %v17_v1 = vld [vmem:[%s186_s1] sm:$0xff]  ;;  %v18_v2 = vld [vmem:[%s186_s1 + $0x8] sm:$0xff]  ;;  %v19_v3 = vld [vmem:[%s186_s1 + $0x10] sm:$0xff]  ;;  %127 = vmatprep.mubr.msk.f32.mxu0 %vm140_vm0, %v141_v4  ;;  %v8_v5 = vstv %s187_s2  ;;  %vm103_vm2 = vcmask 1024  }
   0x2   :  { %v131_v6 = vpack.c.bf16 %v18_v2, %v17_v1  ;;  %v20_v7 = vld [vmem:[%s186_s1 + $0x18] sm:$0xff]  ;;  %9 = vst [vmem:[#allocation2] sm:$0x1] %v8_v5  ;;  %v21_v9 = vld [vmem:[%s186_s1 + $0x20] sm:$0xff] }
   0x3   :  { %v134_v8 = vpack.c.bf16 %v20_v7, %v19_v3  ;;  %v16_v10 = vld [vmem:[%s188_s0] sm:$0x3] }
   0x4   :  { %132 = vmatpush3.bf16.msra.mxu0 %v131_v6 }
   0x5   :  { %133 = vmatprep.subr.bf16.mxu0 %v139_v0 }
   0x8   :  { %135 = vmatpush3.bf16.msra.mxu0 %v134_v8 }
   0x9   :  { %125 = vmatprep.subr.mxu0 %v141_v4  ;;  %v109_v11 = vld [vmem:[#allocation2] ss:$0 sm:$0xff] }
   0xc   :  { %126 = vmatpush3.msra.mxu0 %v21_v9 }
   0xd   :  { %128 = vmatmul.mubr.msk.f32.vlgmr.msra.gmra.mrb[0].mxu0 %vm29_vm1, %v16_v10 }
  0xe0   :  { %v99_v12 = vpop.f32.mrb[0].mxu0 }
  0xe1   :  { %v100_v13 = vadd.f32 %v109_v11, %v99_v12  ;;  %v129_v14 = vpop.f32.mrb[1].mxu0 }
  0xe3   :  { %104 = vst.msk [vmem:[%s189_s3] sm:$0x3] %vm103_vm2, %v100_v13 }

</bundles_post_ra>
